<compile_context>
chip_gen: v6e
topology: v6e:2x2x1
jax: 0.10.0
libtpu: 0.0.40
codegen_flags: <defaults>
</compile_context>

<pallas_src>
import jax
import jax.numpy as jnp
import numpy as np
from jax.experimental import pallas as pl
from jax.experimental.pallas import tpu as pltpu

EPS = 1e-5
LANE = 128


def _round_up(x, m):
    return (x + m - 1) // m * m


def _vmem_budget_bytes():
    # Generation-aware VMEM budget: ~70% of physical capacity, capped at
    # 100 MiB (v5e/v6e have 128 MiB, v7x only 64 MiB per TensorCore).
    try:
        cap = pltpu.get_tpu_info().vmem_capacity_bytes
    except Exception:
        cap = 64 * 1024 * 1024  # conservative (v7x-sized) fallback
    return min(int(cap * 0.7), 100 * 1024 * 1024)


def _pick_f_tile(F, B, C_pad, budget):
    """Largest multiple-of-128 divisor of F whose working set fits `budget`.
    Prefers TF == F (single grid step) whenever it fits."""
    # Resident across the whole grid: (B, C_pad) f32 output + padded bias.
    resident = B * C_pad * 4 + 2 * C_pad * 4

    def working_set(tf):
        # Double-buffered per-step inputs: x tile (f32), fused gamma/beta
        # tile (f32), weight tile (bf16).
        return resident + 2 * (B * tf * 4 + 2 * tf * 4 + tf * C_pad * 2)

    if working_set(F) <= budget:
        return F
    best = None
    t = LANE
    while t < F:
        if F % t == 0 and working_set(t) <= budget:
            best = t
        t += LANE
    return best if best is not None else F


def fc_classifier_kernel(x_ref, gb_ref, w_ref, b_ref, o_ref):
    # x_ref:  (B, TF)      feature tile (f32)
    # gb_ref: (2, TF)      fused [gamma; beta] tile (f32)
    # w_ref:  (TF, C_pad)  classifier weight tile (bf16, lane-padded)
    # b_ref:  (1, C_pad)   classifier bias (f32, lane-padded)
    # o_ref:  (B, C_pad)   logits (f32) — resident accumulator across the grid
    k = pl.program_id(0)

    @pl.when(k == 0)
    def _():
        o_ref[...] = jnp.zeros_like(o_ref)

    x = x_ref[...].astype(jnp.float32)                          # (B, TF)

    # Training-mode BatchNorm1d stats for this F-tile (two-pass variance).
    mean = jnp.mean(x, axis=0, keepdims=True)                   # (1, TF)  XLU
    xc = x - mean                                               # (B, TF)
    var = jnp.mean(xc * xc, axis=0, keepdims=True)              # biased var
    inv_std = jax.lax.rsqrt(var + EPS)                          # EUP

    # Fold BN into a per-feature scale/shift: y = (x - mean)*gamma*rsqrt + beta
    s = gb_ref[0:1, :] * inv_std                                # (1, TF)
    y = xc * s + gb_ref[1:2, :]                                 # (B, TF)

    # MXU matmul: bf16 operands, f32 accumulate directly into the output.
    o_ref[...] += jnp.dot(y.astype(jnp.bfloat16), w_ref[...],
                          preferred_element_type=jnp.float32)

    @pl.when(k == pl.num_programs(0) - 1)
    def _():
        o_ref[...] += b_ref[...]


def prepare_classifier_params(weight, bias, gamma, beta):
    """One-time prep (hoisted out of the per-call path): transpose + lane-pad
    + bf16-cast the classifier weight, pad the bias, fuse gamma/beta."""
    C, F = weight.shape
    C_pad = _round_up(C, LANE)
    w_t = jnp.zeros((F, C_pad), jnp.float32).at[:, :C].set(jnp.transpose(weight))
    w_t = w_t.astype(jnp.bfloat16)
    b_pad = jnp.zeros((1, C_pad), jnp.float32).at[:, :C].set(
        bias.reshape(1, C).astype(jnp.float32))
    gb = jnp.stack([gamma.astype(jnp.float32),
                    beta.astype(jnp.float32)], axis=0)           # (2, F)
    return w_t, b_pad, gb, C


def fc_classifier_forward(features, w_t, b_pad, gb, n_classes, *, f_tile=None):
    """features: (B, F) f32; w_t: (F, C_pad) bf16; b_pad: (1, C_pad) f32;
    gb: (2, F) f32. Returns logits (B, n_classes) f32."""
    B, F = features.shape
    C_pad = w_t.shape[1]
    if B % 8 != 0:
        raise ValueError(
            "batch size must be a multiple of 8 (sublane alignment); zero-"
            "padding the batch would corrupt BatchNorm statistics")

    budget = _vmem_budget_bytes()
    TF = _pick_f_tile(F, B, C_pad, budget) if f_tile is None else f_tile
    assert F % TF == 0, "feature dim must be divisible by the F tile"

    cost = pl.CostEstimate(
        flops=2 * B * F * C_pad + 8 * B * F,
        transcendentals=F,
        bytes_accessed=(B * F * 4 + F * C_pad * 2 + 2 * F * 4
                        + C_pad * 4 + B * C_pad * 4),
    )

    out_padded = pl.pallas_call(
        fc_classifier_kernel,
        out_shape=jax.ShapeDtypeStruct((B, C_pad), jnp.float32),
        grid_spec=pltpu.PrefetchScalarGridSpec(
            num_scalar_prefetch=0,
            grid=(F // TF,),
            in_specs=[
                pl.BlockSpec((B, TF), lambda k: (0, k)),       # features
                pl.BlockSpec((2, TF), lambda k: (0, k)),       # [gamma; beta]
                pl.BlockSpec((TF, C_pad), lambda k: (k, 0)),   # weight^T
                pl.BlockSpec((1, C_pad), lambda k: (0, 0)),    # bias
            ],
            out_specs=pl.BlockSpec((B, C_pad), lambda k: (0, 0)),
        ),
        compiler_params=pltpu.CompilerParams(
            dimension_semantics=("arbitrary",),
            vmem_limit_bytes=budget,
        ),
        cost_estimate=cost,
    )(features.astype(jnp.float32), gb, w_t, b_pad)

    return out_padded[:, :n_classes]


def init_params(key, n_feat, n_classes):
    kw, kb = jax.random.split(key)
    # Xavier uniform for the classifier weight (fan_in=n_feat, fan_out=n_classes).
    limit = float(np.sqrt(6.0 / (n_feat + n_classes)))
    w = jax.random.uniform(kw, (n_classes, n_feat), jnp.float32, -limit, limit)
    # PyTorch Linear default bias init: U(-1/sqrt(fan_in), 1/sqrt(fan_in)).
    b_lim = 1.0 / float(np.sqrt(n_feat))
    bias = jax.random.uniform(kb, (n_classes,), jnp.float32, -b_lim, b_lim)
    # BatchNorm1d affine params: gamma=1, beta=0.
    gamma = jnp.ones((n_feat,), jnp.float32)
    beta = jnp.zeros((n_feat,), jnp.float32)
    return gamma, beta, w, bias


def reference_forward_f32(features, gamma, beta, weight, bias):
    # PyTorch-semantics reference, all f32 (BatchNorm1d train mode + Linear).
    x = features.astype(jnp.float32)
    mean = jnp.mean(x, axis=0, keepdims=True)
    var = jnp.mean((x - mean) ** 2, axis=0, keepdims=True)
    y = (x - mean) * jax.lax.rsqrt(var + EPS) * gamma.reshape(1, -1) \
        + beta.reshape(1, -1)
    return y @ weight.T + bias.reshape(1, -1)


def reference_forward_matched(features, gamma, beta, weight, bias):
    # Same numerics as the kernel (two-pass variance, fused BN scale/shift,
    # bf16 MXU operands, f32 accumulate) for a tight structural check.
    x = features.astype(jnp.float32)
    mean = jnp.mean(x, axis=0, keepdims=True)
    xc = x - mean
    var = jnp.mean(xc * xc, axis=0, keepdims=True)
    inv_std = jax.lax.rsqrt(var + EPS)
    y = xc * (gamma.reshape(1, -1) * inv_std) + beta.reshape(1, -1)
    return jnp.dot(y.astype(jnp.bfloat16),
                   jnp.transpose(weight).astype(jnp.bfloat16),
                   preferred_element_type=jnp.float32) + bias.reshape(1, -1)


if __name__ == "__main__":
    B, N_FEAT, N_CLASSES = 8, 1024, 16     # module default n_feat=1024
    MODALITY = "RGB"

    key = jax.random.PRNGKey(0)
    k_data, k_param = jax.random.split(key)

    data = {MODALITY: jax.random.normal(k_data, (B, N_FEAT), jnp.float32)}
    gamma, beta, weight, bias = init_params(k_param, N_FEAT, N_CLASSES)

    # One-time parameter prep (cached across forward calls).
    w_t, b_pad, gb, n_classes = prepare_classifier_params(weight, bias, gamma, beta)

    features = data[MODALITY]
    out = fc_classifier_forward(features, w_t, b_pad, gb, n_classes)
    out = jax.block_until_ready(out)
    out_np = np.asarray(out)

    # Tight check against a precision-matched reference (validates the kernel
    # structure: tiled reduction, BN fold, bias, padding/slicing).
    ref_matched = np.asarray(
        reference_forward_matched(features, gamma, beta, weight, bias))
    np.testing.assert_allclose(out_np, ref_matched, rtol=1e-3, atol=1e-3)

    # Looser check against the full-f32 PyTorch-semantics reference; slack is
    # the bf16 rounding of the MXU operands.
    ref_f32 = np.asarray(
        reference_forward_f32(features, gamma, beta, weight, bias))
    np.testing.assert_allclose(out_np, ref_f32, rtol=3e-2, atol=3e-2)

    print("KERNEL_OK")
</pallas_src>

<mosaic_0001>
module attributes {stable_mosaic.version = 11 : i64} {
  func.func @fc_classifier_kernel(%arg0: i32, %arg1: memref<8x1024xf32, #tpu.memory_space<vmem>>, %arg2: memref<2x1024xf32, #tpu.memory_space<vmem>>, %arg3: memref<1024x128xbf16, #tpu.memory_space<vmem>>, %arg4: memref<1x128xf32, #tpu.memory_space<vmem>>, %arg5: memref<8x128xf32, #tpu.memory_space<vmem>>) attributes {dimension_semantics = [#tpu.dimension_semantics<arbitrary>], iteration_bounds = array<i64: 1>, scalar_prefetch = 0 : i64, scratch_operands = 0 : i64, tpu.core_type = #tpu.core_type<tc>, window_params = [{transform_indices = @transform_0, window_bounds = array<i64: 8, 1024>}, {transform_indices = @transform_1, window_bounds = array<i64: 2, 1024>}, {transform_indices = @transform_2, window_bounds = array<i64: 1024, 128>}, {pipeline_mode = #tpu.pipeline_mode<synchronous>, transform_indices = @transform_3, window_bounds = array<i64: 1, 128>}, {pipeline_mode = #tpu.pipeline_mode<synchronous>, transform_indices = @transform_4, window_bounds = array<i64: 8, 128>}]} {
    %c0_i32 = arith.constant 0 : i32
    %0 = arith.cmpi eq, %arg0, %c0_i32 : i32
    %1 = arith.extui %0 : i1 to i32
    %c0_i32_0 = arith.constant 0 : i32
    %2 = arith.cmpi ne, %1, %c0_i32_0 : i32
    scf.if %2 {
      %cst_18 = arith.constant 0.000000e+00 : f32
      %34 = vector.broadcast %cst_18 : f32 to vector<8x128xf32>
      %c0_19 = arith.constant 0 : index
      %c0_20 = arith.constant 0 : index
      %35 = vector.load %arg5[%c0_19, %c0_20] : memref<8x128xf32, #tpu.memory_space<vmem>>, vector<8x128xf32>
      tpu.vector_store %arg5[%c0_19, %c0_20], %34 {strides = array<i32>} : memref<8x128xf32, #tpu.memory_space<vmem>>, vector<8x128xf32>,
    } else {
    }
    %c0 = arith.constant 0 : index
    %c0_1 = arith.constant 0 : index
    %3 = vector.load %arg1[%c0, %c0_1] : memref<8x1024xf32, #tpu.memory_space<vmem>>, vector<8x1024xf32>
    %cst = arith.constant dense<0.000000e+00> : vector<1024xf32>
    %4 = vector.multi_reduction <add>, %3, %cst [0] : vector<8x1024xf32> to vector<1024xf32>
    %5 = vector.shape_cast %4 : vector<1024xf32> to vector<1x1024xf32>
    %cst_2 = arith.constant 8.000000e+00 : f32
    %6 = vector.broadcast %cst_2 : f32 to vector<1x1024xf32>
    %7 = arith.divf %5, %6 : vector<1x1024xf32>
    %8 = vector.broadcast %7 : vector<1x1024xf32> to vector<8x1024xf32>
    %9 = arith.subf %3, %8 : vector<8x1024xf32>
    %10 = arith.mulf %9, %9 : vector<8x1024xf32>
    %cst_3 = arith.constant dense<0.000000e+00> : vector<1024xf32>
    %11 = vector.multi_reduction <add>, %10, %cst_3 [0] : vector<8x1024xf32> to vector<1024xf32>
    %12 = vector.shape_cast %11 : vector<1024xf32> to vector<1x1024xf32>
    %cst_4 = arith.constant 8.000000e+00 : f32
    %13 = vector.broadcast %cst_4 : f32 to vector<1x1024xf32>
    %14 = arith.divf %12, %13 : vector<1x1024xf32>
    %cst_5 = arith.constant 9.99999974E-6 : f32
    %15 = vector.broadcast %cst_5 : f32 to vector<1x1024xf32>
    %16 = arith.addf %14, %15 : vector<1x1024xf32>
    %17 = math.rsqrt %16 : vector<1x1024xf32>
    %c0_6 = arith.constant 0 : index
    %c0_7 = arith.constant 0 : index
    %18 = vector.load %arg2[%c0_6, %c0_7] : memref<2x1024xf32, #tpu.memory_space<vmem>>, vector<1x1024xf32>
    %19 = arith.mulf %18, %17 : vector<1x1024xf32>
    %20 = vector.broadcast %19 : vector<1x1024xf32> to vector<8x1024xf32>
    %21 = arith.mulf %9, %20 : vector<8x1024xf32>
    %c1 = arith.constant 1 : index
    %c0_8 = arith.constant 0 : index
    %22 = vector.load %arg2[%c1, %c0_8] : memref<2x1024xf32, #tpu.memory_space<vmem>>, vector<1x1024xf32>
    %23 = vector.broadcast %22 : vector<1x1024xf32> to vector<8x1024xf32>
    %24 = arith.addf %21, %23 : vector<8x1024xf32>
    %c0_9 = arith.constant 0 : index
    %c0_10 = arith.constant 0 : index
    %25 = vector.load %arg5[%c0_9, %c0_10] : memref<8x128xf32, #tpu.memory_space<vmem>>, vector<8x128xf32>
    %26 = arith.truncf %24 : vector<8x1024xf32> to vector<8x1024xbf16>
    %c0_11 = arith.constant 0 : index
    %c0_12 = arith.constant 0 : index
    %27 = vector.load %arg3[%c0_11, %c0_12] : memref<1024x128xbf16, #tpu.memory_space<vmem>>, vector<1024x128xbf16>
    %cst_13 = arith.constant dense<0.000000e+00> : vector<8x128xf32>
    %28 = tpu.matmul %26, %27, %cst_13 {dimension_numbers = #tpu.dot_dimension_numbers<[1], [0], [0], [1], [0, 0, 1, 1], [], []>} : vector<8x1024xbf16>, vector<1024x128xbf16>, vector<8x128xf32> -> vector<8x128xf32>
    %29 = arith.addf %25, %28 : vector<8x128xf32>
    %c0_14 = arith.constant 0 : index
    %c0_15 = arith.constant 0 : index
    %30 = vector.load %arg5[%c0_14, %c0_15] : memref<8x128xf32, #tpu.memory_space<vmem>>, vector<8x128xf32>
    tpu.vector_store %arg5[%c0_14, %c0_15], %29 {strides = array<i32>} : memref<8x128xf32, #tpu.memory_space<vmem>>, vector<8x128xf32>,
    %c0_i32_16 = arith.constant 0 : i32
    %31 = arith.cmpi eq, %arg0, %c0_i32_16 : i32
    %32 = arith.extui %31 : i1 to i32
    %c0_i32_17 = arith.constant 0 : i32
    %33 = arith.cmpi ne, %32, %c0_i32_17 : i32
    scf.if %33 {
      %c0_18 = arith.constant 0 : index
      %c0_19 = arith.constant 0 : index
      %34 = vector.load %arg5[%c0_18, %c0_19] : memref<8x128xf32, #tpu.memory_space<vmem>>, vector<8x128xf32>
      %c0_20 = arith.constant 0 : index
      %c0_21 = arith.constant 0 : index
      %35 = vector.load %arg4[%c0_20, %c0_21] : memref<1x128xf32, #tpu.memory_space<vmem>>, vector<1x128xf32>
      %36 = vector.broadcast %35 : vector<1x128xf32> to vector<8x128xf32>
      %37 = arith.addf %34, %36 : vector<8x128xf32>
      %c0_22 = arith.constant 0 : index
      %c0_23 = arith.constant 0 : index
      %38 = vector.load %arg5[%c0_22, %c0_23] : memref<8x128xf32, #tpu.memory_space<vmem>>, vector<8x128xf32>
      tpu.vector_store %arg5[%c0_22, %c0_23], %37 {strides = array<i32>} : memref<8x128xf32, #tpu.memory_space<vmem>>, vector<8x128xf32>,
    } else {
    }
    return
  }
  func.func @transform_0(%arg0: i32) -> (i32, i32) {
    %c0_i32 = arith.constant 0 : i32
    %c0_i32_0 = arith.constant 0 : i32
    return %c0_i32, %arg0 : i32, i32
  }
  func.func @transform_1(%arg0: i32) -> (i32, i32) {
    %c0_i32 = arith.constant 0 : i32
    %c0_i32_0 = arith.constant 0 : i32
    return %c0_i32, %arg0 : i32, i32
  }
  func.func @transform_2(%arg0: i32) -> (i32, i32) {
    %c0_i32 = arith.constant 0 : i32
    %c0_i32_0 = arith.constant 0 : i32
    return %arg0, %c0_i32 : i32, i32
  }
  func.func @transform_3(%arg0: i32) -> (i32, i32) {
    %c0_i32 = arith.constant 0 : i32
    %c0_i32_0 = arith.constant 0 : i32
    %c0_i32_1 = arith.constant 0 : i32
    return %c0_i32, %c0_i32_0 : i32, i32
  }
  func.func @transform_4(%arg0: i32) -> (i32, i32) {
    %c0_i32 = arith.constant 0 : i32
    %c0_i32_0 = arith.constant 0 : i32
    %c0_i32_1 = arith.constant 0 : i32
    return %c0_i32, %c0_i32_0 : i32, i32
  }
}

</mosaic_0001>

<bundles_post_ra>
// kernel: tpu_custom_call.1
= control target key start
LH: loop header
LB: loop body
LE: loop exit
PB: predicated region body
PF: predicated region fallthrough
CT: control target
= control target key end

     0   :  { %9 = vsyncpa [#allocation3], 0  ;;  %s1571_s0 = inlined_call_operand.hbm [shape: f32[8,1024], index: 0, kind: input, shape index: {}]   ;;  %s1572_s1 = inlined_call_operand.hbm [shape: f32[2,1024], index: 1, kind: input, shape index: {}]   ;;  %s1573_s2 = inlined_call_operand.hbm [shape: bf16[1024,128], index: 2, kind: input, shape index: {}]   ;;  %s1574_s3 = inlined_call_operand.vmem [shape: f32[1,128], index: 3, kind: input, shape index: {}]   ;;  %s1575_s4 = inlined_call_operand.hbm [shape: f32[8,128], index: 4, kind: output, shape index: {}]  }
   0x1   :  { %10 = vsyncpa [#allocation6], 0 }
   0x2   :  { %11 = vsyncpa [#allocation4], 0  ;;  %s1413_s15 = smov [#allocation5]   ;;  %s1414_s17 = smov [#allocation2]  }
   0x3   :  { %s28_s16 = sshll.u32 %s1413_s15, 4  ;;  %s18_s18 = sshll.u32 %s1414_s17, 4  ;;  %s29_s16 = int_to_ptr.vmem [resolvable:$true] %s28_s16  ;;  %s19_s18 = int_to_ptr.vmem [resolvable:$true] %s18_s18 }
   0x4   :  { %s1335_s19 = scalar_lea.vmem %s29_s16, 256  ;;  %p1340_p1 = scmp.lt.s32.totalorder %s29_s16, %s29_s16 }
   0x5   :  { %p1336_p0 = scmp.ne.s32.totalorder %s29_s16, %s1335_s19  ;;  %p1341_p2 = scmp.lt.s32.totalorder %s1335_s19, %s1335_s19 }
   0x7   :  { %p1342_p3 = por %p1341_p2, %p1340_p1 }
   0x9   :  { %p1343_p4 = pnand %p1342_p3, %p1336_p0 }
   0xb   :  { %1346 = shalt.err (!%p1343_p4)
}
   0xc   :  { %31 = dma.hbm_to_vmem [thread:$0]  %s1572_s1, 256, %s29_s16, [#allocation6]  }
   0xd   :  { %s1355_s22 = scalar_lea.vmem %s19_s18, 1024  ;;  %p1360_p6 = scmp.lt.s32.totalorder %s19_s18, %s19_s18 }
   0xe   :  { %p1356_p5 = scmp.ne.s32.totalorder %s19_s18, %s1355_s22  ;;  %p1361_p7 = scmp.lt.s32.totalorder %s1355_s22, %s1355_s22 }
  0x10   :  { %p1362_p8 = por %p1361_p7, %p1360_p6 }
  0x12   :  { %p1363_p9 = pnand %p1362_p8, %p1356_p5 }
  0x14   :  { %1366 = shalt.err (!%p1363_p9)
}
  0x15   :  { %21 = dma.hbm_to_vmem [thread:$0]  %s1571_s0, 1024, %s19_s18, [#allocation3]  }
  0x16   :  { %s1415_s25 = smov [#allocation7]  }
  0x17   :  { %s37_s26 = sshll.u32 %s1415_s25, 4  ;;  %s38_s26 = int_to_ptr.vmem [resolvable:$true] %s37_s26 }
  0x18   :  { %s1375_s27 = scalar_lea.vmem %s38_s26, 8192  ;;  %p1380_p11 = scmp.lt.s32.totalorder %s38_s26, %s38_s26 }
  0x19   :  { %p1376_p10 = scmp.ne.s32.totalorder %s38_s26, %s1375_s27  ;;  %p1381_p12 = scmp.lt.s32.totalorder %s1375_s27, %s1375_s27 }
  0x1b   :  { %p1382_p13 = por %p1381_p12, %p1380_p11 }
  0x1d   :  { %p1383_p0 = pnand %p1382_p13, %p1376_p10 }
  0x1f   :  { %1386 = shalt.err (!%p1383_p0)
}
  0x20   :  { %s1416_s1 = smov 64   ;;  %s1417_s28 = smov 4  }
  0x21   :  { %43 = dma.hbm_to_vmem [thread:$0]  %s1573_s2, 8192, %s38_s26, [#allocation6], %s1416_s1, %s1416_s1, %s1417_s28  }
  0x22   :  { %1407 = dma.done.wait [#allocation3], 1024  }
  0x23   :  { %1408 = vsyncadd [#allocation3], 4294966272 }
  0x24   :  { %1409 = dma.done.wait [#allocation6], 8448  }
  0x25   :  { %1410 = vsyncadd [#allocation6], 4294958848  ;;  %v1247_v0 = vld [vmem:[#allocation7 + $0x78] sm:$0xff]   ;;  %v1251_v4 = vld [vmem:[#allocation7 + $0x70] sm:$0xff]   ;;  %s1419_s5 = smov [#allocation8]  }
  0x26   :  { %v1248_v1 = vld [vmem:[#allocation7 + $0xf8] sm:$0xff]   ;;  %1151 = vmatprep.subr.bf16.mxu0 %v1247_v0  ;;  %v1252_v5 = vld [vmem:[#allocation7 + $0xf0] sm:$0xff]   ;;  %v1255_v8 = vld [vmem:[#allocation7 + $0x68] sm:$0xff]   ;;  %s1076_s6 = sshll.u32 %s1419_s5, 4  ;;  %s1077_s6 = int_to_ptr.vmem [resolvable:$true] %s1076_s6 }
  0x27   :  { %v1249_v2 = vld [vmem:[#allocation7 + $0x38] sm:$0xff]   ;;  %1173 = vmatprep.subr.bf16.mxu1 %v1248_v1  ;;  %v1253_v6 = vld [vmem:[#allocation7 + $0x30] sm:$0xff]   ;;  %v1256_v9 = vld [vmem:[#allocation7 + $0xe8] sm:$0xff]   ;;  %s1387_s7 = scalar_lea.vmem %s1077_s6, 128  ;;  %p1392_p2 = scmp.lt.s32.totalorder %s1077_s6, %s1077_s6 }
  0x28   :  { %v1250_v3 = vld [vmem:[#allocation7 + $0xb8] sm:$0xff]   ;;  %1152 = vmatpush3.bf16.msra.mxu0 %v1249_v2  ;;  %v1254_v7 = vld [vmem:[#allocation7 + $0xb0] sm:$0xff]   ;;  %v1257_v10 = vld [vmem:[#allocation7 + $0x28] sm:$0xff]   ;;  %p1388_p1 = scmp.ne.s32.totalorder %s1077_s6, %s1387_s7  ;;  %p1393_p3 = scmp.lt.s32.totalorder %s1387_s7, %s1387_s7 }
  0x29   :  { %1174 = vmatpush3.bf16.msra.mxu1 %v1250_v3  ;;  %1153 = vmatprep.subr.bf16.mxu0 %v1251_v4  ;;  %v1258_v11 = vld [vmem:[#allocation7 + $0xa8] sm:$0xff]   ;;  %v1259_v12 = vld [vmem:[#allocation7 + $0x60] sm:$0xff]   ;;  %v1263_v16 = vld [vmem:[#allocation7 + $0x58] sm:$0xff]  }
  0x2a   :  { %1175 = vmatprep.subr.bf16.mxu1 %v1252_v5  ;;  %v1260_v13 = vld [vmem:[#allocation7 + $0xe0] sm:$0xff]   ;;  %v1264_v17 = vld [vmem:[#allocation7 + $0xd8] sm:$0xff]   ;;  %v1267_v20 = vld [vmem:[#allocation7 + $0x50] sm:$0xff]   ;;  %p1394_p4 = por %p1393_p3, %p1392_p2 }
  0x2b   :  { %v1261_v14 = vld [vmem:[#allocation7 + $0x20] sm:$0xff]   ;;  %v1265_v18 = vld [vmem:[#allocation7 + $0x18] sm:$0xff]   ;;  %v1268_v21 = vld [vmem:[#allocation7 + $0xd0] sm:$0xff]  }
  0x2c   :  { %1154 = vmatpush3.bf16.msra.mxu0 %v1253_v6  ;;  %v1262_v15 = vld [vmem:[#allocation7 + $0xa0] sm:$0xff]   ;;  %v1266_v19 = vld [vmem:[#allocation7 + $0x98] sm:$0xff]   ;;  %v1269_v22 = vld [vmem:[#allocation7 + $0x10] sm:$0xff]   ;;  %p1395_p5 = pnand %p1394_p4, %p1388_p1 }
  0x2d   :  { %1176 = vmatpush3.bf16.msra.mxu1 %v1254_v7  ;;  %1155 = vmatprep.subr.bf16.mxu0 %v1255_v8  ;;  %v1270_v23 = vld [vmem:[#allocation7 + $0x90] sm:$0xff]   ;;  %v1271_v24 = vld [vmem:[#allocation7 + $0x48] sm:$0xff]   ;;  %v1275_v28 = vld [vmem:[#allocation7 + $0x40] sm:$0xff]  }
  0x2e   :  { %1177 = vmatprep.subr.bf16.mxu1 %v1256_v9  ;;  %v1272_v25 = vld [vmem:[#allocation7 + $0xc8] sm:$0xff]   ;;  %v1276_v29 = vld [vmem:[#allocation7 + $0xc0] sm:$0xff]   ;;  %v1454_v32 = vld [vmem:[#allocation2] sm:$0xff] }
  0x2f   :  { %v1273_v26 = vld [vmem:[#allocation7 + $0x8] sm:$0xff]   ;;  %v1277_v30 = vld [vmem:[#allocation7] sm:$0xff]   ;;  %v1456_v33 = vld [vmem:[#allocation2 + $0x8] sm:$0xff]  ;;  %v69_v38 = vrot.slane %v1454_v32, 4 }
  0x30   :  { %1156 = vmatpush3.bf16.msra.mxu0 %v1257_v10  ;;  %v1274_v27 = vld [vmem:[#allocation7 + $0x88] sm:$0xff]   ;;  %v1278_v31 = vld [vmem:[#allocation7 + $0x80] sm:$0xff]   ;;  %v1462_v36 = vld [vmem:[#allocation2 + $0x20] sm:$0xff]  ;;  %v75_v39 = vrot.slane %v1456_v33, 4 }
  0x31   :  { %1178 = vmatpush3.bf16.msra.mxu1 %v1258_v11  ;;  %1157 = vmatprep.subr.bf16.mxu0 %v1259_v12  ;;  %v1458_v34 = vld [vmem:[#allocation2 + $0x10] sm:$0xff]  ;;  %v1460_v35 = vld [vmem:[#allocation2 + $0x18] sm:$0xff]  ;;  %v1464_v37 = vld [vmem:[#allocation2 + $0x28] sm:$0xff]  ;;  %v93_v44 = vrot.slane %v1462_v36, 4  ;;  %v70_v47 = vadd.f32 %v69_v38, %v1454_v32 }
  0x32   :  { %1179 = vmatprep.subr.bf16.mxu1 %v1260_v13  ;;  %v81_v40 = vrot.slane %v1458_v34, 4  ;;  %v1469_v41 = vld [vmem:[#allocation2 + $0x30] sm:$0xff]  ;;  %v1471_v42 = vld [vmem:[#allocation2 + $0x38] sm:$0xff]  ;;  %v87_v43 = vrot.slane %v1460_v35, 4  ;;  %v99_v45 = vrot.slane %v1464_v37, 4  ;;  %v1279_v46 = vld [vmem:[#allocation7 + $0x178] sm:$0xff]   ;;  %v76_v48 = vadd.f32 %v75_v39, %v1456_v33 }
  0x33   :  { %v105_v50 = vrot.slane %v1469_v41, 4  ;;  %v1280_v51 = vld [vmem:[#allocation7 + $0x1f8] sm:$0xff]   ;;  %v94_v53 = vadd.f32 %v93_v44, %v1462_v36  ;;  %v111_v55 = vrot.slane %v1471_v42, 4  ;;  %v71_v56 = vrot.slane %v70_v47, 2 }
  0x34   :  { %1158 = vmatpush3.bf16.msra.mxu0 %v1261_v14  ;;  %v82_v49 = vadd.f32 %v81_v40, %v1458_v34  ;;  %v88_v52 = vadd.f32 %v87_v43, %v1460_v35  ;;  %v100_v54 = vadd.f32 %v99_v45, %v1464_v37  ;;  %v77_v57 = vrot.slane %v76_v48, 2 }
  0x35   :  { %1180 = vmatpush3.bf16.msra.mxu1 %v1262_v15  ;;  %1159 = vmatprep.subr.bf16.mxu0 %v1263_v16  ;;  %v106_v59 = vadd.f32 %v105_v50, %v1469_v41  ;;  %v95_v61 = vrot.slane %v94_v53, 2  ;;  %v112_v63 = vadd.f32 %v111_v55, %v1471_v42  ;;  %v72_v0 = vadd.f32 %v71_v56, %v70_v47 }
  0x36   :  { %1181 = vmatprep.subr.bf16.mxu1 %v1264_v17  ;;  %v83_v58 = vrot.slane %v82_v49, 2  ;;  %v89_v60 = vrot.slane %v88_v52, 2  ;;  %v101_v62 = vrot.slane %v100_v54, 2  ;;  %v78_v1 = vadd.f32 %v77_v57, %v76_v48 }
  0x37   :  { %v107_v3 = vrot.slane %v106_v59, 2  ;;  %v96_v5 = vadd.f32 %v95_v61, %v94_v53  ;;  %v113_v7 = vrot.slane %v112_v63, 2  ;;  %v73_v8 = vrot.slane %v72_v0, 1 }
  0x38   :  { %1160 = vmatpush3.bf16.msra.mxu0 %v1265_v18  ;;  %v84_v2 = vadd.f32 %v83_v58, %v82_v49  ;;  %v90_v4 = vadd.f32 %v89_v60, %v88_v52  ;;  %v102_v6 = vadd.f32 %v101_v62, %v100_v54  ;;  %v79_v9 = vrot.slane %v78_v1, 1 }
  0x39   :  { %1182 = vmatpush3.bf16.msra.mxu1 %v1266_v19  ;;  %1161 = vmatprep.subr.bf16.mxu0 %v1267_v20  ;;  %v108_v11 = vadd.f32 %v107_v3, %v106_v59  ;;  %v97_v13 = vrot.slane %v96_v5, 1  ;;  %v114_v15 = vadd.f32 %v113_v7, %v112_v63  ;;  %v74_v16 = vadd.f32 %v73_v8, %v72_v0 }
  0x3a   :  { %1183 = vmatprep.subr.bf16.mxu1 %v1268_v21  ;;  %v85_v10 = vrot.slane %v84_v2, 1  ;;  %v91_v12 = vrot.slane %v90_v4, 1  ;;  %v103_v14 = vrot.slane %v102_v6, 1  ;;  %v80_v17 = vadd.f32 %v79_v9, %v78_v1 }
  0x3b   :  { %v109_v19 = vrot.slane %v108_v11, 1  ;;  %v98_v21 = vadd.f32 %v97_v13, %v96_v5 }
  0x3c   :  { %1162 = vmatpush3.bf16.msra.mxu0 %v1269_v22  ;;  %v86_v18 = vadd.f32 %v85_v10, %v84_v2  ;;  %v92_v20 = vadd.f32 %v91_v12, %v90_v4  ;;  %v104_v22 = vadd.f32 %v103_v14, %v102_v6 }
  0x3d   :  { %1184 = vmatpush3.bf16.msra.mxu1 %v1270_v23  ;;  %1163 = vmatprep.subr.bf16.mxu0 %v1271_v24  ;;  %v115_v23 = vrot.slane %v114_v15, 1  ;;  %v110_v24 = vadd.f32 %v109_v19, %v108_v11 }
  0x3e   :  { %1185 = vmatprep.subr.bf16.mxu1 %v1272_v25  ;;  %v118_v25 = vmul.f32 0.125, %v74_v16 }
  0x3f   :  { %v124_v38 = vmul.f32 0.125, %v110_v24 }
  0x40   :  { %1164 = vmatpush3.bf16.msra.mxu0 %v1273_v26  ;;  %v119_v26 = vmul.f32 0.125, %v80_v17  ;;  %v1487_v39 = vsub.f32 %v1454_v32, %v118_v25 }
  0x41   :  { %1186 = vmatpush3.bf16.msra.mxu1 %v1274_v27  ;;  %1165 = vmatprep.subr.bf16.mxu0 %v1275_v28  ;;  %v120_v27 = vmul.f32 0.125, %v86_v18  ;;  %v116_v28 = vadd.f32 %v115_v23, %v114_v15  ;;  %v1505_v48 = vsub.f32 %v1469_v41, %v124_v38 }
  0x42   :  { %1187 = vmatprep.subr.bf16.mxu1 %v1276_v29  ;;  %v121_v29 = vmul.f32 0.125, %v92_v20  ;;  %v1490_v40 = vsub.f32 %v1456_v33, %v119_v26  ;;  %v134_v32 = vmul.f32 %v1487_v39, %v1487_v39 }
  0x43   :  { %v1493_v43 = vsub.f32 %v1458_v34, %v120_v27  ;;  %v125_v44 = vmul.f32 0.125, %v116_v28  ;;  %v140_v49 = vmul.f32 %v1505_v48, %v1505_v48 }
  0x44   :  { %1166 = vmatpush3.bf16.msra.mxu0 %v1277_v30  ;;  %v122_v30 = vmul.f32 0.125, %v98_v21  ;;  %v1496_v45 = vsub.f32 %v1460_v35, %v121_v29  ;;  %v135_v33 = vmul.f32 %v1490_v40, %v1490_v40  ;;  %v142_v50 = vrot.slane %v134_v32, 4 }
  0x45   :  { %1188 = vmatpush3.bf16.msra.mxu1 %v1278_v31  ;;  %1195 = vmatprep.subr.bf16.mxu0 %v1279_v46  ;;  %v123_v31 = vmul.f32 0.125, %v104_v22  ;;  %v136_v34 = vmul.f32 %v1493_v43, %v1493_v43  ;;  %v1514_v35 = vsub.f32 %v1471_v42, %v125_v44  ;;  %v178_v59 = vrot.slane %v140_v49, 4 }
  0x46   :  { %1217 = vmatprep.subr.bf16.mxu1 %v1280_v51  ;;  %v1499_v46 = vsub.f32 %v1462_v36, %v122_v30  ;;  %v137_v36 = vmul.f32 %v1496_v45, %v1496_v45  ;;  %v148_v51 = vrot.slane %v135_v33, 4  ;;  %v143_v56 = vadd.f32 %v142_v50, %v134_v32 }
  0x47   :  { %v1502_v47 = vsub.f32 %v1464_v37, %v123_v31  ;;  %v154_v52 = vrot.slane %v136_v34, 4  ;;  %v141_v53 = vmul.f32 %v1514_v35, %v1514_v35  ;;  %v179_v3 = vadd.f32 %v178_v59, %v140_v49 }
  0x48   :  { %v138_v37 = vmul.f32 %v1499_v46, %v1499_v46  ;;  %v160_v42 = vrot.slane %v137_v36, 4  ;;  %v149_v57 = vadd.f32 %v148_v51, %v135_v33  ;;  %v144_v0 = vrot.slane %v143_v56, 2 }
  0x49   :  { %v139_v41 = vmul.f32 %v1502_v47, %v1502_v47  ;;  %v155_v58 = vadd.f32 %v154_v52, %v136_v34  ;;  %v184_v63 = vrot.slane %v141_v53, 4  ;;  %v180_v11 = vrot.slane %v179_v3, 2 }
  0x4a   :  { %v166_v54 = vrot.slane %v138_v37, 4  ;;  %v161_v60 = vadd.f32 %v160_v42, %v137_v36  ;;  %v150_v1 = vrot.slane %v149_v57, 2  ;;  %v145_v8 = vadd.f32 %v144_v0, %v143_v56 }
  0x4b   :  { %v172_v55 = vrot.slane %v139_v41, 4  ;;  %v156_v2 = vrot.slane %v155_v58, 2  ;;  %v185_v7 = vadd.f32 %v184_v63, %v141_v53  ;;  %v181_v19 = vadd.f32 %v180_v11, %v179_v3 }
  0x4c   :  { %v167_v61 = vadd.f32 %v166_v54, %v138_v37  ;;  %v162_v4 = vrot.slane %v161_v60, 2  ;;  %v151_v9 = vadd.f32 %v150_v1, %v149_v57  ;;  %v146_v16 = vrot.slane %v145_v8, 1 }
  0x4d   :  { %v173_v62 = vadd.f32 %v172_v55, %v139_v41  ;;  %v157_v10 = vadd.f32 %v156_v2, %v155_v58  ;;  %v186_v15 = vrot.slane %v185_v7, 2  ;;  %v182_v27 = vrot.slane %v181_v19, 1 }
  0x4e   :  { %v168_v5 = vrot.slane %v167_v61, 2  ;;  %v163_v12 = vadd.f32 %v162_v4, %v161_v60  ;;  %v152_v17 = vrot.slane %v151_v9, 1  ;;  %v147_v24 = vadd.f32 %v146_v16, %v145_v8 }
  0x4f   :  { %v174_v6 = vrot.slane %v173_v62, 2  ;;  %v158_v18 = vrot.slane %v157_v10, 1  ;;  %v187_v23 = vadd.f32 %v186_v15, %v185_v7  ;;  %v183_v38 = vadd.f32 %v182_v27, %v181_v19 }
  0x50   :  { %v169_v13 = vadd.f32 %v168_v5, %v167_v61  ;;  %v164_v20 = vrot.slane %v163_v12, 1  ;;  %v153_v25 = vadd.f32 %v152_v17, %v151_v9  ;;  %v190_v44 = vmul.f32 0.125, %v147_v24 }
  0x51   :  { %v175_v14 = vadd.f32 %v174_v6, %v173_v62  ;;  %v159_v26 = vadd.f32 %v158_v18, %v157_v10  ;;  %v188_v31 = vrot.slane %v187_v23, 1  ;;  %v196_v49 = vmul.f32 0.125, %v183_v38 }
  0x52   :  { %v170_v21 = vrot.slane %v169_v13, 1  ;;  %v165_v28 = vadd.f32 %v164_v20, %v163_v12  ;;  %v191_v32 = vmul.f32 0.125, %v153_v25  ;;  %v198_v50 = vadd.f32 1e-05, %v190_v44  ;;  %v214_v20 = vld [vmem:[#allocation5] ss:$2 sm:$0xff] }
  0x53   :  { %v176_v22 = vrot.slane %v175_v14, 1  ;;  %v192_v33 = vmul.f32 0.125, %v159_v26  ;;  %v189_v34 = vadd.f32 %v188_v31, %v187_v23  ;;  %v204_v56 = vadd.f32 1e-05, %v196_v49  ;;  %v1530_v23 = vld [vmem:[#allocation5 + $0x1] ss:$2 sm:$0xff] }
  0x54   :  { %v171_v29 = vadd.f32 %v170_v21, %v169_v13  ;;  %v193_v36 = vmul.f32 0.125, %v165_v28  ;;  %v199_v51 = vadd.f32 1e-05, %v191_v32  ;;  %1311 = vrsqrt.f32 %v198_v50 }
  0x55   :  { %v177_v30 = vadd.f32 %v176_v22, %v175_v14  ;;  %v197_v52 = vmul.f32 0.125, %v189_v34  ;;  %v200_v53 = vadd.f32 1e-05, %v192_v33  ;;  %v1418_v58 = vmov 1966171168  }
  0x56   :  { %v194_v37 = vmul.f32 0.125, %v171_v29  ;;  %v201_v42 = vadd.f32 1e-05, %v193_v36  ;;  %1313 = vrsqrt.f32 %v199_v51  ;;  %v228_v59 = vunpack.c.l.s4 %v1418_v58 }
  0x57   :  { %v195_v41 = vmul.f32 0.125, %v177_v30  ;;  %v205_v57 = vadd.f32 1e-05, %v197_v52  ;;  %1315 = vrsqrt.f32 %v200_v53  ;;  %v230_v60 = vlaneseq }
  0x58   :  { %v202_v54 = vadd.f32 1e-05, %v194_v37  ;;  %1317 = vrsqrt.f32 %v201_v42  ;;  %v229_v61 = vunpack.c.0.s8 %v228_v59 }
  0x59   :  { %v203_v55 = vadd.f32 1e-05, %v195_v41  ;;  %v1526_v62 = vshrl.u32 %v230_v60, 7 }
  0x5a   :  { %1319 = vrsqrt.f32 %v202_v54 }
  0x5b   :  { %1321 = vrsqrt.f32 %v203_v55  ;;  %v232_v0 = vsub.s32 %v229_v61, %v1526_v62  ;;  %v281_v21 = vsub.s32 1, %v1526_v62  ;;  %v289_v24 = vsub.s32 3, %v1526_v62 }
  0x5c   :  { %1323 = vrsqrt.f32 %v204_v56  ;;  %v277_v25 = vsub.s32 0, %v1526_v62  ;;  %v285_v26 = vsub.s32 2, %v1526_v62  ;;  %v297_v27 = vsub.s32 5, %v1526_v62 }
  0x5d   :  { %1325 = vrsqrt.f32 %v205_v57  ;;  %v305_v28 = vsub.s32 7, %v1526_v62  ;;  %v333_v30 = vrot.slane %v1530_v23, %v281_v21  ;;  %v341_v31 = vrot.slane %v1530_v23, %v289_v24 }
  0x5e   :  { %v329_v38 = vrot.slane %v1530_v23, %v277_v25  ;;  %v337_v44 = vrot.slane %v1530_v23, %v285_v26  ;;  %v349_v41 = vrot.slane %v1530_v23, %v297_v27 }
  0x5f   :  { %v357_v50 = vrot.slane %v1530_v23, %v305_v28 }
  0x61   :  { %v1312_v63 = vpop.eup %1311 }
  0x63   :  { %v1314_v1 = vpop.eup %1313 }
  0x64   :  { %v1316_v2 = vpop.eup %1315  ;;  %v223_v3 = vcombine.low %v1312_v63, %v1314_v1 }
  0x65   :  { %v1318_v4 = vpop.eup %1317 }
  0x66   :  { %v224_v6 = vcombine.low %v1316_v2, %v1318_v4  ;;  %v233_v7 = vrot.slane %v223_v3, %v232_v0  ;;  %v1281_v2 = vld [vmem:[#allocation7 + $0x138] sm:$0xff]   ;;  %v1283_v3 = vld [vmem:[#allocation7 + $0x170] sm:$0xff]  }
  0x67   :  { %v1320_v5 = vpop.eup %1319  ;;  %v1286_v4 = vld [vmem:[#allocation7 + $0x1b0] sm:$0xff]  }
  0x68   :  { %v1322_v8 = vpop.eup %1321  ;;  %v240_v11 = vrot.slane %v224_v6, %v232_v0  ;;  %v1288_v6 = vld [vmem:[#allocation7 + $0x1e8] sm:$0xff]  }
  0x69   :  { %v1324_v9 = vpop.eup %1323  ;;  %v225_v10 = vcombine.low %v1320_v5, %v1322_v8  ;;  %v1287_v5 = vld [vmem:[#allocation7 + $0x168] sm:$0xff]  }
  0x6a   :  { %v1326_v12 = vpop.eup %1325  ;;  %v255_v15 = vcombine.low %v233_v7, %v240_v11  ;;  %v1289_v7 = vld [vmem:[#allocation7 + $0x128] sm:$0xff]   ;;  %v1293_v11 = vld [vmem:[#allocation7 + $0x120] sm:$0xff]  }
  0x6b   :  { %v226_v13 = vcombine.low %v1324_v9, %v1326_v12  ;;  %v247_v14 = vrot.slane %v225_v10, %v232_v0  ;;  %v1290_v8 = vld [vmem:[#allocation7 + $0x1a8] sm:$0xff]   ;;  %v1291_v9 = vld [vmem:[#allocation7 + $0x160] sm:$0xff]  }
  0x6c   :  { %v263_v18 = vrot.slane %v255_v15, %v232_v0  ;;  %v1292_v10 = vld [vmem:[#allocation7 + $0x1e0] sm:$0xff]   ;;  %v293_v15 = vsub.s32 4, %v1526_v62 }
  0x6d   :  { %v254_v16 = vrot.slane %v226_v13, %v232_v0  ;;  %v1294_v12 = vld [vmem:[#allocation7 + $0x1a0] sm:$0xff]   ;;  %v1295_v13 = vld [vmem:[#allocation7 + $0x158] sm:$0xff]  }
  0x6f   :  { %v256_v17 = vcombine.low %v247_v14, %v254_v16  ;;  %v1296_v14 = vld [vmem:[#allocation7 + $0x1d8] sm:$0xff]   ;;  %v301_v16 = vsub.s32 6, %v1526_v62  ;;  %v1304_v62 = vld [vmem:[#allocation7 + $0x1c8] sm:$0xff]  }
  0x71   :  { %v270_v19 = vrot.slane %v256_v17, %v232_v0  ;;  %v1297_v17 = vld [vmem:[#allocation7 + $0x118] sm:$0xff]  }
  0x73   :  { %v271_v22 = vcombine.low %v263_v18, %v270_v19  ;;  %v1298_v18 = vld [vmem:[#allocation7 + $0x198] sm:$0xff]   ;;  %v1299_v19 = vld [vmem:[#allocation7 + $0x150] sm:$0xff]  }
  0x75   :  { %v1537_v29 = vmul.f32 %v271_v22, %v214_v20  ;;  %v1300_v20 = vld [vmem:[#allocation7 + $0x1d0] sm:$0xff]  }
  0x77   :  { %v282_v32 = vrot.slane %v1537_v29, %v281_v21  ;;  %v290_v33 = vrot.slane %v1537_v29, %v289_v24  ;;  %v278_v34 = vrot.slane %v1537_v29, %v277_v25  ;;  %v286_v36 = vrot.slane %v1537_v29, %v285_v26  ;;  %v1301_v24 = vld [vmem:[#allocation7 + $0x110] sm:$0xff]   ;;  %v1303_v26 = vld [vmem:[#allocation7 + $0x148] sm:$0xff]  }
  0x78   :  { %v298_v37 = vrot.slane %v1537_v29, %v297_v27  ;;  %v306_v49 = vrot.slane %v1537_v29, %v305_v28  ;;  %v294_v21 = vrot.slane %v1537_v29, %v293_v15  ;;  %v302_v22 = vrot.slane %v1537_v29, %v301_v16  ;;  %v1302_v25 = vld [vmem:[#allocation7 + $0x190] sm:$0xff]   ;;  %v1306_v29 = vld [vmem:[#allocation7 + $0x188] sm:$0xff]  }
  0x79   :  { %v316_v51 = vmul.f32 %v282_v32, %v1490_v40  ;;  %v318_v52 = vmul.f32 %v290_v33, %v1496_v45  ;;  %v315_v53 = vmul.f32 %v278_v34, %v1487_v39  ;;  %v317_v42 = vmul.f32 %v286_v36, %v1493_v43  ;;  %v1282_v45 = vld [vmem:[#allocation7 + $0x1b8] sm:$0xff]   ;;  %v1284_v39 = vld [vmem:[#allocation7 + $0x1f0] sm:$0xff]   ;;  %v1308_v32 = vld [vmem:[#allocation7 + $0x1c0] sm:$0xff]  }
  0x7a   :  { %v320_v54 = vmul.f32 %v298_v37, %v1502_v47  ;;  %v322_v55 = vmul.f32 %v306_v49, %v1514_v35  ;;  %v1285_v35 = vld [vmem:[#allocation7 + $0x130] sm:$0xff]   ;;  %v319_v27 = vmul.f32 %v294_v21, %v1499_v46  ;;  %v345_v28 = vrot.slane %v1530_v23, %v293_v15  ;;  %v1309_v36 = vld [vmem:[#allocation7 + $0x100] sm:$0xff]  }
  0x7b   :  { %v367_v56 = vadd.f32 %v333_v30, %v316_v51  ;;  %v369_v57 = vadd.f32 %v341_v31, %v318_v52  ;;  %v366_v58 = vadd.f32 %v329_v38, %v315_v53  ;;  %v368_v59 = vadd.f32 %v337_v44, %v317_v42  ;;  %v1305_v38 = vld [vmem:[#allocation7 + $0x108] sm:$0xff]   ;;  %v1307_v44 = vld [vmem:[#allocation7 + $0x140] sm:$0xff]  }
  0x7c   :  { %v371_v60 = vadd.f32 %v349_v41, %v320_v54  ;;  %v373_v61 = vadd.f32 %v357_v50, %v322_v55  ;;  %v321_v30 = vmul.f32 %v302_v22, %v1505_v48  ;;  %v353_v31 = vrot.slane %v1530_v23, %v301_v16  ;;  %v1310_v46 = vld [vmem:[#allocation7 + $0x180] sm:$0xff]  }
  0x7d   :  { %v376_v63 = vpack.c.bf16 %v367_v56, %v367_v56  ;;  %v378_v0 = vpack.c.bf16 %v369_v57, %v369_v57  ;;  %v375_v1 = vpack.c.bf16 %v366_v58, %v366_v58  ;;  %v377_v40 = vpack.c.bf16 %v368_v59, %v368_v59 }
  0x7e   :  { %v380_v43 = vpack.c.bf16 %v371_v60, %v371_v60  ;;  %v382_v47 = vpack.c.bf16 %v373_v61, %v373_v61  ;;  %v370_v33 = vadd.f32 %v345_v28, %v319_v27  ;;  %v372_v34 = vadd.f32 %v353_v31, %v321_v30 }
  0x7f   :  { %927 = vmatprep.mubr.bf16.mxu0 %v376_v63  ;;  %967 = vmatprep.mubr.bf16.mxu1 %v378_v0 }
  0x80   :  { %928 = vmatmul.mubr.bf16.vlgmr.msra.gmra.mxu0 %v375_v1  ;;  %968 = vmatmul.mubr.bf16.vlgmr.msra.gmra.mxu1 %v377_v40  ;;  %v379_v37 = vpack.c.bf16 %v370_v33, %v370_v33  ;;  %v381_v48 = vpack.c.bf16 %v372_v34, %v372_v34 }
  0x81   :  { %1196 = vmatpush3.bf16.msra.mxu0 %v1281_v2  ;;  %1218 = vmatpush3.bf16.msra.mxu1 %v1282_v45 }
  0x82   :  { %1197 = vmatprep.subr.bf16.mxu0 %v1283_v3  ;;  %1219 = vmatprep.subr.bf16.mxu1 %v1284_v39  ;;  %v1150_v39 = vld [vmem:[%s1574_s3] ss:$0 sm:$0xff] }
  0x83   :  { %1007 = vmatprep.mubr.bf16.mxu0 %v380_v43  ;;  %1047 = vmatprep.mubr.bf16.mxu1 %v382_v47 }
  0x85   :  { %1198 = vmatpush3.bf16.msra.mxu0 %v1285_v35  ;;  %1220 = vmatpush3.bf16.msra.mxu1 %v1286_v4 }
  0x86   :  { %1199 = vmatprep.subr.bf16.mxu0 %v1287_v5  ;;  %1221 = vmatprep.subr.bf16.mxu1 %v1288_v6 }
  0x89   :  { %1200 = vmatpush3.bf16.msra.mxu0 %v1289_v7  ;;  %1222 = vmatpush3.bf16.msra.mxu1 %v1290_v8 }
  0x8a   :  { %1201 = vmatprep.subr.bf16.mxu0 %v1291_v9  ;;  %1223 = vmatprep.subr.bf16.mxu1 %v1292_v10 }
  0x8d   :  { %1202 = vmatpush3.bf16.msra.mxu0 %v1293_v11  ;;  %1224 = vmatpush3.bf16.msra.mxu1 %v1294_v12 }
  0x8e   :  { %1203 = vmatprep.subr.bf16.mxu0 %v1295_v13  ;;  %1225 = vmatprep.subr.bf16.mxu1 %v1296_v14 }
  0x91   :  { %1204 = vmatpush3.bf16.msra.mxu0 %v1297_v17  ;;  %1226 = vmatpush3.bf16.msra.mxu1 %v1298_v18 }
  0x92   :  { %1205 = vmatprep.subr.bf16.mxu0 %v1299_v19  ;;  %1227 = vmatprep.subr.bf16.mxu1 %v1300_v20 }
  0x95   :  { %1206 = vmatpush3.bf16.msra.mxu0 %v1301_v24  ;;  %1228 = vmatpush3.bf16.msra.mxu1 %v1302_v25 }
  0x96   :  { %1207 = vmatprep.subr.bf16.mxu0 %v1303_v26  ;;  %1229 = vmatprep.subr.bf16.mxu1 %v1304_v62 }
  0x99   :  { %1208 = vmatpush3.bf16.msra.mxu0 %v1305_v38  ;;  %1230 = vmatpush3.bf16.msra.mxu1 %v1306_v29 }
  0x9a   :  { %1209 = vmatprep.subr.bf16.mxu0 %v1307_v44  ;;  %1231 = vmatprep.subr.bf16.mxu1 %v1308_v32 }
  0x9d   :  { %1210 = vmatpush3.bf16.msra.mxu0 %v1309_v36  ;;  %1232 = vmatpush3.bf16.msra.mxu1 %v1310_v46 }
  0xa0   :  { %1008 = vmatmul.mubr.bf16.vlgmr.msra.gmra.mxu0 %v379_v37  ;;  %1048 = vmatmul.mubr.bf16.vlgmr.msra.gmra.mxu1 %v381_v48 }
 0x140   :  { %v1167_v23 = vpop.f32.mrf.mxu0  ;;  %v1189_v41 = vpop.f32.mrf.mxu1 }
 0x142   :  { %v1168_v49 = vpop.f32.mrf.mxu0  ;;  %v1190_v50 = vpop.f32.mrf.mxu1 }
 0x143   :  { %v1169_v54 = vadd.f32 %v1168_v49, %v1167_v23  ;;  %v1191_v55 = vadd.f32 %v1190_v50, %v1189_v41 }
 0x144   :  { %v1170_v51 = vpop.f32.mrf.mxu0  ;;  %v1192_v52 = vpop.f32.mrf.mxu1 }
 0x145   :  { %v970_v60 = vadd.f32 %v1191_v55, %v1169_v54 }
 0x146   :  { %v1171_v53 = vpop.f32.mrf.mxu0  ;;  %v1193_v42 = vpop.f32.mrf.mxu1 }
 0x160   :  { %v1211_v56 = vpop.f32.mrf.mxu0  ;;  %v1233_v57 = vpop.f32.mrf.mxu1 }
 0x162   :  { %v1212_v58 = vpop.f32.mrf.mxu0  ;;  %v1234_v59 = vpop.f32.mrf.mxu1 }
 0x163   :  { %v1213_v61 = vadd.f32 %v1212_v58, %v1211_v56  ;;  %v1235_v40 = vadd.f32 %v1234_v59, %v1233_v57 }
 0x164   :  { %v1214_v63 = vpop.f32.mrf.mxu0  ;;  %v1236_v0 = vpop.f32.mrf.mxu1 }
 0x165   :  { %v1010_v1 = vadd.f32 %v1213_v61, %v970_v60 }
 0x166   :  { %v1215_v2 = vpop.f32.mrf.mxu0  ;;  %v1237_v45 = vpop.f32.mrf.mxu1 }
 0x167   :  { %v1050_v3 = vadd.f32 %v1235_v40, %v1010_v1 }
 0x169   :  { %v1068_v43 = vadd.f32 %v1150_v39, %v1050_v3 }
 0x16b   :  { %1069 = vst [vmem:[#allocation8] sm:$0xff] %v1068_v43 }
 0x16c   :  { %1398 = shalt.err (!%p1395_p5)
}
 0x16d   :  { %1079 = dma.vmem_to_hbm [thread:$0]  %s1077_s6, 128, %s1575_s4, [#allocation4]  }
 0x16e   :  { %1411 = dma.done.wait [#allocation4], 128  }
 0x16f   :  { %1412 = vsyncadd [#allocation4], 4294967168 }
 0x170   :  { %1083 = vsyncpa [#allocation3], 1 }
 0x171   :  { %1084 = vsyncpa [#allocation6], 1 }
 0x172   :  { %1085 = vsyncpa [#allocation4], 1 }

</bundles_post_ra>
